<compile_context>
chip_gen: v5e
topology: v5e:2x2
jax: 0.10.0
libtpu: 0.0.40
codegen_flags: <defaults>
</compile_context>

<pallas_src>
import functools

import jax
import jax.numpy as jnp
from jax import lax
from jax.experimental import pallas as pl
from jax.experimental.pallas import tpu as pltpu


_LANE = 128
_SUBLANE = 8
_FUSED_BATCH_TILE = 256           # batch rows per fused grid step
_HBM_BW_BYTES_PER_S = 0.8e12      # conservative (v5e); heuristic only
_GRID_STEP_OVERHEAD_S = 0.35e-6   # measured per-grid-step overhead


def _round_up(n, m):
    return ((n + m - 1) // m) * m


def _vmem_capacity_bytes():
    """Physical VMEM per core; conservative 64 MiB (v7x) fallback."""
    try:
        cap = int(pltpu.get_tpu_info().vmem_capacity_bytes)
        if cap > 0:
            return cap
    except Exception:
        pass
    return 64 * 1024 * 1024


# ----------------------------------------------------------------------------
# Parameter preparation: call ONCE, reuse (hoists padding out of the hot path).
# ----------------------------------------------------------------------------
def prepare_critic_params(w1, b1, w2, b2):
    """Pad feature dims to lane (128) multiples and interleave per-block Linears.

    w1/w2: (L, D, D) in in-dim x out-dim layout (y = x @ W + b, i.e. transposed
    vs torch's nn.Linear.weight); b1/b2: (L, D).
    Returns (W, B): W (2L, Dp, Dp), B (2L, 1, Dp).  Zero padding of weight
    rows/cols and biases is exact for Linear->ReLU->Linear.
    """
    n_layers, d, d2 = w1.shape
    assert d == d2 and w2.shape == w1.shape
    assert b1.shape == (n_layers, d) and b2.shape == (n_layers, d)
    dp = _round_up(max(d, _LANE), _LANE)
    pad_w = ((0, 0), (0, dp - d), (0, dp - d))
    pad_b = ((0, 0), (0, dp - d))
    w = jnp.stack([jnp.pad(w1, pad_w), jnp.pad(w2, pad_w)], axis=1)
    w = w.reshape(2 * n_layers, dp, dp)
    b = jnp.stack([jnp.pad(b1, pad_b), jnp.pad(b2, pad_b)], axis=1)
    b = b.reshape(2 * n_layers, 1, dp)
    return w, b


# ----------------------------------------------------------------------------
# Kernels
# ----------------------------------------------------------------------------
def _linear_step(step, w, bvec, h):
    """One Linear in f32 accumulation; ReLU on even steps (first Linear of a block)."""
    y = jnp.dot(h.astype(w.dtype), w, preferred_element_type=jnp.float32)
    y = y + bvec.astype(jnp.float32)
    relu_floor = jnp.where(step % 2 == 0, 0.0, -jnp.inf).astype(jnp.float32)
    return jnp.maximum(y, relu_floor)      # max(y, -inf) == y on odd steps


def _critic_fused_kernel(x_ref, w_ref, b_ref, o_ref, h_ref):
    """All 2L Linears in one invocation; weights VMEM-resident; f32 carry scratch."""
    n_steps = w_ref.shape[0]                          # static at trace time
    h_ref[...] = x_ref[...].astype(jnp.float32)

    def body(s, _):
        h_ref[...] = _linear_step(s, w_ref[s], b_ref[s], h_ref[...])
        return 0

    lax.fori_loop(0, n_steps, body, 0, unroll=(n_steps <= 32))
    o_ref[...] = h_ref[...].astype(o_ref.dtype)       # single lane-dense store


def _make_layered_kernel(separate_carry):
    """One Linear per grid step.  Carry lives in the resident output block (f32
    activations) or in a separate f32 VMEM scratch (sub-f32 activations)."""

    def step_fn(x_ref, w_ref, b_ref, o_ref, h_ref):
        step = pl.program_id(0)

        @pl.when(step == 0)
        def _():
            h_ref[...] = x_ref[...].astype(h_ref.dtype)

        y = _linear_step(step, w_ref[0], b_ref[0], h_ref[...])
        h_ref[...] = y.astype(h_ref.dtype)

        @pl.when(step == pl.num_programs(0) - 1)
        def _():
            o_ref[...] = y.astype(o_ref.dtype)        # write output exactly once

    if separate_carry:
        def kernel(x_ref, w_ref, b_ref, o_ref, h_ref):
            step_fn(x_ref, w_ref, b_ref, o_ref, h_ref)
    else:
        def kernel(x_ref, w_ref, b_ref, o_ref):
            step_fn(x_ref, w_ref, b_ref, o_ref, o_ref)
    return kernel


# ----------------------------------------------------------------------------
# Wrapper
# ----------------------------------------------------------------------------
@functools.partial(jax.jit, static_argnames=("fuse_layers",))
def critic_forward(x, w, b, *, fuse_layers=None):
    """Critic forward.  x: (B, D); (w, b) from prepare_critic_params.

    For tiny shapes (D <= 128, B <= 8) the MXU tile is >90% padding and runtime
    is pure per-call overhead: amortize by batching many evaluations into B.
    """
    n_steps, dp, dp2 = w.shape
    assert dp == dp2 and dp % _LANE == 0
    assert b.shape == (n_steps, 1, dp)
    bsz, d = x.shape
    assert d <= dp

    capacity = _vmem_capacity_bytes()
    itemsize_x = x.dtype.itemsize
    itemsize_w = w.dtype.itemsize
    weight_bytes = n_steps * dp * dp * itemsize_w
    bias_bytes = n_steps * dp * b.dtype.itemsize

    # Fused-path geometry: batch-tiled grid, weights fully VMEM-resident.
    bt = (_FUSED_BATCH_TILE if bsz > _FUSED_BATCH_TILE
          else _round_up(max(bsz, _SUBLANE), _SUBLANE))
    bp_fused = _round_up(bsz, bt)
    fused_need = (2 * (weight_bytes + bias_bytes)     # resident weight/bias blocks
                  + 2 * bt * dp * itemsize_x          # x batch tile (double-buffered)
                  + 2 * bt * dp * itemsize_x          # out batch tile
                  + bt * dp * 4)                      # f32 carry scratch
    fused_fits = fused_need <= 0.7 * capacity

    # Prefer the layered (pipelined) path when a single layer's weight DMA
    # dwarfs the ~0.35us grid-step overhead: layered overlaps the next Linear's
    # weight DMA with the current matmul; fused serializes one big weight copy
    # with all compute.
    per_block_dma_s = 2 * dp * dp * itemsize_w / _HBM_BW_BYTES_PER_S
    layered_wins = (n_steps > 2) and (per_block_dma_s > 10 * _GRID_STEP_OVERHEAD_S)

    if fuse_layers is None:
        fuse_layers = fused_fits and not layered_wins

    cost = pl.CostEstimate(
        flops=2 * n_steps * _round_up(bsz, _SUBLANE) * dp * dp,
        transcendentals=0,
        bytes_accessed=int(weight_bytes + bias_bytes
                           + 2 * _round_up(bsz, _SUBLANE) * dp * itemsize_x),
    )

    if fuse_layers:
        bp = bp_fused
        xp = jnp.pad(x, ((0, bp - bsz), (0, dp - d)))
        vmem_limit = int(min(max(int(1.25 * fused_need), 32 * 1024 * 1024),
                             int(0.9 * capacity)))
        grid_spec = pltpu.PrefetchScalarGridSpec(
            num_scalar_prefetch=0,
            grid=(bp // bt,),
            in_specs=[
                pl.BlockSpec((bt, dp), lambda i: (i, 0)),               # x batch tile
                pl.BlockSpec((n_steps, dp, dp), lambda i: (0, 0, 0)),   # all weights, resident
                pl.BlockSpec((n_steps, 1, dp), lambda i: (0, 0, 0)),    # all biases, resident
            ],
            out_specs=pl.BlockSpec((bt, dp), lambda i: (i, 0)),
            scratch_shapes=[pltpu.VMEM((bt, dp), jnp.float32)],         # f32 carry
        )
        out = pl.pallas_call(
            _critic_fused_kernel,
            out_shape=jax.ShapeDtypeStruct((bp, dp), x.dtype),
            grid_spec=grid_spec,
            compiler_params=pltpu.CompilerParams(
                dimension_semantics=("parallel",),    # batch tiles independent (megacore on v7x)
                vmem_limit_bytes=vmem_limit,
            ),
            cost_estimate=cost,
        )(xp, w, b)
    else:
        bp = _round_up(max(bsz, _SUBLANE), _SUBLANE)
        xp = jnp.pad(x, ((0, bp - bsz), (0, dp - d)))
        out_is_carry = x.dtype == jnp.float32
        carry_bytes = 0 if out_is_carry else bp * dp * 4
        layered_need = (2 * (dp * dp + dp) * itemsize_w   # one Linear's W/b, double-buffered
                        + 2 * bp * dp * itemsize_x        # x (constant block index)
                        + 2 * bp * dp * itemsize_x        # resident output block
                        + carry_bytes)
        # TODO(synk): if a single double-buffered (Dp, Dp) weight pair still
        # exceeds the VMEM budget (huge Dp) or batch is huge, add an inner
        # feature-chunk / batch-tile grid axis.
        vmem_limit = int(min(max(int(1.25 * layered_need), 32 * 1024 * 1024),
                             int(0.9 * capacity)))
        scratch_shapes = [] if out_is_carry else [pltpu.VMEM((bp, dp), jnp.float32)]
        grid_spec = pltpu.PrefetchScalarGridSpec(
            num_scalar_prefetch=0,
            grid=(n_steps,),                                   # one Linear per step
            in_specs=[
                pl.BlockSpec((bp, dp), lambda s: (0, 0)),      # x (read at step 0 only)
                pl.BlockSpec((1, dp, dp), lambda s: (s, 0, 0)),  # W of step s
                pl.BlockSpec((1, 1, dp), lambda s: (s, 0, 0)),   # b of step s
            ],
            out_specs=pl.BlockSpec((bp, dp), lambda s: (0, 0)),  # resident output block
            scratch_shapes=scratch_shapes,
        )
        out = pl.pallas_call(
            _make_layered_kernel(separate_carry=not out_is_carry),
            out_shape=jax.ShapeDtypeStruct((bp, dp), x.dtype),
            grid_spec=grid_spec,
            compiler_params=pltpu.CompilerParams(
                dimension_semantics=("arbitrary",),   # sequential layer dependency
                vmem_limit_bytes=vmem_limit,
            ),
            cost_estimate=cost,
        )(xp, w, b)

    return out[:bsz, :d]


# ----------------------------------------------------------------------------
# Reference / init / demo
# ----------------------------------------------------------------------------
def init_critic_params(key, n_layers, block_dims, dtype=jnp.float32):
    """nn.Linear-style init (uniform +/- 1/sqrt(fan_in)), in-dim x out-dim layout."""
    bound = 1.0 / (block_dims ** 0.5)
    ks = jax.random.split(key, 4)
    shape_w = (n_layers, block_dims, block_dims)
    shape_b = (n_layers, block_dims)
    w1 = jax.random.uniform(ks[0], shape_w, dtype, -bound, bound)
    b1 = jax.random.uniform(ks[1], shape_b, dtype, -bound, bound)
    w2 = jax.random.uniform(ks[2], shape_w, dtype, -bound, bound)
    b2 = jax.random.uniform(ks[3], shape_b, dtype, -bound, bound)
    return w1, b1, w2, b2


def critic_reference(x, w1, b1, w2, b2):
    """Pure-JAX reference of the PyTorch forward."""
    h = x
    for l in range(w1.shape[0]):
        h = jnp.maximum(h @ w1[l] + b1[l], 0.0)
        h = h @ w2[l] + b2[l]
    return h


if __name__ == "__main__":
    n_layers = 3
    block_dims = 32
    batch = 4

    key = jax.random.PRNGKey(0)
    k_x, k_p, k_xb = jax.random.split(key, 3)
    x = jax.random.normal(k_x, (batch, block_dims), jnp.float32)
    w1, b1, w2, b2 = init_critic_params(k_p, n_layers, block_dims)

    # One-time padding / interleaving (hoisted out of the per-call path).
    w, bvec = prepare_critic_params(w1, b1, w2, b2)
    w, bvec = jax.block_until_ready((w, bvec))

    ref = critic_reference(x, w1, b1, w2, b2)

    # Fused path: weights VMEM-resident, single invocation.
    out_fused = jax.block_until_ready(critic_forward(x, w, bvec))
    assert out_fused.shape == (batch, block_dims)
    assert jnp.allclose(out_fused, ref, atol=1e-4, rtol=1e-4), "fused mismatch"

    # Layered path: one Linear per "arbitrary" grid step, f32 output block as carry.
    out_layered = jax.block_until_ready(critic_forward(x, w, bvec, fuse_layers=False))
    assert jnp.allclose(out_layered, ref, atol=1e-4, rtol=1e-4), "layered mismatch"

    # Batch-tiled fused grid ("parallel" batch axis; megacore split on v7x).
    x_big = jax.random.normal(k_xb, (260, block_dims), jnp.float32)
    ref_big = critic_reference(x_big, w1, b1, w2, b2)
    out_big = jax.block_until_ready(critic_forward(x_big, w, bvec, fuse_layers=True))
    assert jnp.allclose(out_big, ref_big, atol=1e-4, rtol=1e-4), "batch-tiled mismatch"

    # bf16 weight storage (recommended on v5e: halves weight HBM traffic, MXU-native).
    wb, bb = (a.astype(jnp.bfloat16) for a in (w, bvec))
    out_bf16 = jax.block_until_ready(critic_forward(x, wb, bb))
    assert jnp.allclose(out_bf16, ref, atol=1e-1, rtol=1e-1), "bf16-weight mismatch"

    # bf16 activations exercise the layered path's separate f32 scratch carry.
    out_bf16_act = jax.block_until_ready(
        critic_forward(x.astype(jnp.bfloat16), wb, bb, fuse_layers=False))
    assert jnp.allclose(out_bf16_act.astype(jnp.float32), ref,
                        atol=2.5e-1, rtol=2.5e-1), "bf16-activation mismatch"

    print("KERNEL_OK")
</pallas_src>

<mosaic_0001>
module attributes {stable_mosaic.version = 11 : i64} {
  func.func @_critic_fused_kernel(%arg0: i32, %arg1: memref<8x128xf32, #tpu.memory_space<vmem>>, %arg2: memref<6x128x128xf32, #tpu.memory_space<vmem>>, %arg3: memref<6x1x128xf32, #tpu.memory_space<vmem>>, %arg4: memref<8x128xf32, #tpu.memory_space<vmem>>, %arg5: memref<8x128xf32, #tpu.memory_space<vmem>>) attributes {dimension_semantics = [#tpu.dimension_semantics<parallel>], iteration_bounds = array<i64: 1>, scalar_prefetch = 0 : i64, scratch_operands = 1 : i64, tpu.core_type = #tpu.core_type<tc>, window_params = [{transform_indices = @transform_0, window_bounds = array<i64: 8, 128>}, {pipeline_mode = #tpu.pipeline_mode<synchronous>, transform_indices = @transform_1, window_bounds = array<i64: 6, 128, 128>}, {pipeline_mode = #tpu.pipeline_mode<synchronous>, transform_indices = @transform_2, window_bounds = array<i64: 6, 1, 128>}, {transform_indices = @transform_3, window_bounds = array<i64: 8, 128>}]} {
    %c0 = arith.constant 0 : index
    %c0_0 = arith.constant 0 : index
    %0 = vector.load %arg1[%c0, %c0_0] : memref<8x128xf32, #tpu.memory_space<vmem>>, vector<8x128xf32>
    %c0_1 = arith.constant 0 : index
    %c0_2 = arith.constant 0 : index
    %1 = vector.load %arg5[%c0_1, %c0_2] : memref<8x128xf32, #tpu.memory_space<vmem>>, vector<8x128xf32>
    tpu.vector_store %arg5[%c0_1, %c0_2], %0 {strides = array<i32>} : memref<8x128xf32, #tpu.memory_space<vmem>>, vector<8x128xf32>,
    %c0_i32 = arith.constant 0 : i32
    %2 = arith.index_cast %c0_i32 : i32 to index
    %c0_3 = arith.constant 0 : index
    %c0_4 = arith.constant 0 : index
    %3 = vector.load %arg2[%2, %c0_3, %c0_4] : memref<6x128x128xf32, #tpu.memory_space<vmem>>, vector<1x128x128xf32>
    %4 = vector.shape_cast %3 : vector<1x128x128xf32> to vector<128x128xf32>
    %5 = arith.index_cast %c0_i32 : i32 to index
    %c0_5 = arith.constant 0 : index
    %c0_6 = arith.constant 0 : index
    %6 = vector.load %arg3[%5, %c0_5, %c0_6] : memref<6x1x128xf32, #tpu.memory_space<vmem>>, vector<1x1x128xf32>
    %7 = vector.shape_cast %6 : vector<1x1x128xf32> to vector<1x128xf32>
    %c0_7 = arith.constant 0 : index
    %c0_8 = arith.constant 0 : index
    %8 = vector.load %arg5[%c0_7, %c0_8] : memref<8x128xf32, #tpu.memory_space<vmem>>, vector<8x128xf32>
    %cst = arith.constant dense<0.000000e+00> : vector<8x128xf32>
    %9 = tpu.matmul %8, %4, %cst {dimension_numbers = #tpu.dot_dimension_numbers<[1], [0], [0], [1], [0, 0, 1, 1], [], []>} : vector<8x128xf32>, vector<128x128xf32>, vector<8x128xf32> -> vector<8x128xf32>
    %10 = vector.broadcast %7 : vector<1x128xf32> to vector<8x128xf32>
    %11 = arith.addf %9, %10 : vector<8x128xf32>
    %c2_i32 = arith.constant 2 : i32
    %c0_i32_9 = arith.constant 0 : i32
    %12 = arith.cmpi eq, %c2_i32, %c0_i32_9 : i32
    %c1_i32 = arith.constant 1 : i32
    %13 = arith.select %12, %c1_i32, %c2_i32 : i32
    %14 = arith.remsi %c0_i32, %13 : i32
    %c0_i32_10 = arith.constant 0 : i32
    %15 = arith.cmpi ne, %14, %c0_i32_10 : i32
    %c0_i32_11 = arith.constant 0 : i32
    %16 = arith.cmpi slt, %14, %c0_i32_11 : i32
    %c0_i32_12 = arith.constant 0 : i32
    %17 = arith.cmpi slt, %13, %c0_i32_12 : i32
    %18 = arith.xori %16, %17 : i1
    %19 = arith.andi %18, %15 : i1
    %20 = arith.addi %14, %13 : i32
    %21 = arith.select %19, %20, %14 : i32
    %c0_i32_13 = arith.constant 0 : i32
    %22 = arith.cmpi eq, %21, %c0_i32_13 : i32
    %cst_14 = arith.constant 0.000000e+00 : f32
    %cst_15 = arith.constant 0xFF800000 : f32
    %23 = arith.select %22, %cst_14, %cst_15 : f32
    %24 = vector.broadcast %23 : f32 to vector<8x128xf32>
    %25 = arith.maximumf %11, %24 : vector<8x128xf32>
    %c0_16 = arith.constant 0 : index
    %c0_17 = arith.constant 0 : index
    %26 = vector.load %arg5[%c0_16, %c0_17] : memref<8x128xf32, #tpu.memory_space<vmem>>, vector<8x128xf32>
    tpu.vector_store %arg5[%c0_16, %c0_17], %25 {strides = array<i32>} : memref<8x128xf32, #tpu.memory_space<vmem>>, vector<8x128xf32>,
    %c1_i32_18 = arith.constant 1 : i32
    %27 = arith.index_cast %c1_i32_18 : i32 to index
    %c0_19 = arith.constant 0 : index
    %c0_20 = arith.constant 0 : index
    %28 = vector.load %arg2[%27, %c0_19, %c0_20] : memref<6x128x128xf32, #tpu.memory_space<vmem>>, vector<1x128x128xf32>
    %29 = vector.shape_cast %28 : vector<1x128x128xf32> to vector<128x128xf32>
    %30 = arith.index_cast %c1_i32_18 : i32 to index
    %c0_21 = arith.constant 0 : index
    %c0_22 = arith.constant 0 : index
    %31 = vector.load %arg3[%30, %c0_21, %c0_22] : memref<6x1x128xf32, #tpu.memory_space<vmem>>, vector<1x1x128xf32>
    %32 = vector.shape_cast %31 : vector<1x1x128xf32> to vector<1x128xf32>
    %c0_23 = arith.constant 0 : index
    %c0_24 = arith.constant 0 : index
    %33 = vector.load %arg5[%c0_23, %c0_24] : memref<8x128xf32, #tpu.memory_space<vmem>>, vector<8x128xf32>
    %cst_25 = arith.constant dense<0.000000e+00> : vector<8x128xf32>
    %34 = tpu.matmul %33, %29, %cst_25 {dimension_numbers = #tpu.dot_dimension_numbers<[1], [0], [0], [1], [0, 0, 1, 1], [], []>} : vector<8x128xf32>, vector<128x128xf32>, vector<8x128xf32> -> vector<8x128xf32>
    %35 = vector.broadcast %32 : vector<1x128xf32> to vector<8x128xf32>
    %36 = arith.addf %34, %35 : vector<8x128xf32>
    %c2_i32_26 = arith.constant 2 : i32
    %c0_i32_27 = arith.constant 0 : i32
    %37 = arith.cmpi eq, %c2_i32_26, %c0_i32_27 : i32
    %c1_i32_28 = arith.constant 1 : i32
    %38 = arith.select %37, %c1_i32_28, %c2_i32_26 : i32
    %39 = arith.remsi %c1_i32_18, %38 : i32
    %c0_i32_29 = arith.constant 0 : i32
    %40 = arith.cmpi ne, %39, %c0_i32_29 : i32
    %c0_i32_30 = arith.constant 0 : i32
    %41 = arith.cmpi slt, %39, %c0_i32_30 : i32
    %c0_i32_31 = arith.constant 0 : i32
    %42 = arith.cmpi slt, %38, %c0_i32_31 : i32
    %43 = arith.xori %41, %42 : i1
    %44 = arith.andi %43, %40 : i1
    %45 = arith.addi %39, %38 : i32
    %46 = arith.select %44, %45, %39 : i32
    %c0_i32_32 = arith.constant 0 : i32
    %47 = arith.cmpi eq, %46, %c0_i32_32 : i32
    %cst_33 = arith.constant 0.000000e+00 : f32
    %cst_34 = arith.constant 0xFF800000 : f32
    %48 = arith.select %47, %cst_33, %cst_34 : f32
    %49 = vector.broadcast %48 : f32 to vector<8x128xf32>
    %50 = arith.maximumf %36, %49 : vector<8x128xf32>
    %c0_35 = arith.constant 0 : index
    %c0_36 = arith.constant 0 : index
    %51 = vector.load %arg5[%c0_35, %c0_36] : memref<8x128xf32, #tpu.memory_space<vmem>>, vector<8x128xf32>
    tpu.vector_store %arg5[%c0_35, %c0_36], %50 {strides = array<i32>} : memref<8x128xf32, #tpu.memory_space<vmem>>, vector<8x128xf32>,
    %c2_i32_37 = arith.constant 2 : i32
    %52 = arith.index_cast %c2_i32_37 : i32 to index
    %c0_38 = arith.constant 0 : index
    %c0_39 = arith.constant 0 : index
    %53 = vector.load %arg2[%52, %c0_38, %c0_39] : memref<6x128x128xf32, #tpu.memory_space<vmem>>, vector<1x128x128xf32>
    %54 = vector.shape_cast %53 : vector<1x128x128xf32> to vector<128x128xf32>
    %55 = arith.index_cast %c2_i32_37 : i32 to index
    %c0_40 = arith.constant 0 : index
    %c0_41 = arith.constant 0 : index
    %56 = vector.load %arg3[%55, %c0_40, %c0_41] : memref<6x1x128xf32, #tpu.memory_space<vmem>>, vector<1x1x128xf32>
    %57 = vector.shape_cast %56 : vector<1x1x128xf32> to vector<1x128xf32>
    %c0_42 = arith.constant 0 : index
    %c0_43 = arith.constant 0 : index
    %58 = vector.load %arg5[%c0_42, %c0_43] : memref<8x128xf32, #tpu.memory_space<vmem>>, vector<8x128xf32>
    %cst_44 = arith.constant dense<0.000000e+00> : vector<8x128xf32>
    %59 = tpu.matmul %58, %54, %cst_44 {dimension_numbers = #tpu.dot_dimension_numbers<[1], [0], [0], [1], [0, 0, 1, 1], [], []>} : vector<8x128xf32>, vector<128x128xf32>, vector<8x128xf32> -> vector<8x128xf32>
    %60 = vector.broadcast %57 : vector<1x128xf32> to vector<8x128xf32>
    %61 = arith.addf %59, %60 : vector<8x128xf32>
    %c2_i32_45 = arith.constant 2 : i32
    %c0_i32_46 = arith.constant 0 : i32
    %62 = arith.cmpi eq, %c2_i32_45, %c0_i32_46 : i32
    %c1_i32_47 = arith.constant 1 : i32
    %63 = arith.select %62, %c1_i32_47, %c2_i32_45 : i32
    %64 = arith.remsi %c2_i32_37, %63 : i32
    %c0_i32_48 = arith.constant 0 : i32
    %65 = arith.cmpi ne, %64, %c0_i32_48 : i32
    %c0_i32_49 = arith.constant 0 : i32
    %66 = arith.cmpi slt, %64, %c0_i32_49 : i32
    %c0_i32_50 = arith.constant 0 : i32
    %67 = arith.cmpi slt, %63, %c0_i32_50 : i32
    %68 = arith.xori %66, %67 : i1
    %69 = arith.andi %68, %65 : i1
    %70 = arith.addi %64, %63 : i32
    %71 = arith.select %69, %70, %64 : i32
    %c0_i32_51 = arith.constant 0 : i32
    %72 = arith.cmpi eq, %71, %c0_i32_51 : i32
    %cst_52 = arith.constant 0.000000e+00 : f32
    %cst_53 = arith.constant 0xFF800000 : f32
    %73 = arith.select %72, %cst_52, %cst_53 : f32
    %74 = vector.broadcast %73 : f32 to vector<8x128xf32>
    %75 = arith.maximumf %61, %74 : vector<8x128xf32>
    %c0_54 = arith.constant 0 : index
    %c0_55 = arith.constant 0 : index
    %76 = vector.load %arg5[%c0_54, %c0_55] : memref<8x128xf32, #tpu.memory_space<vmem>>, vector<8x128xf32>
    tpu.vector_store %arg5[%c0_54, %c0_55], %75 {strides = array<i32>} : memref<8x128xf32, #tpu.memory_space<vmem>>, vector<8x128xf32>,
    %c3_i32 = arith.constant 3 : i32
    %77 = arith.index_cast %c3_i32 : i32 to index
    %c0_56 = arith.constant 0 : index
    %c0_57 = arith.constant 0 : index
    %78 = vector.load %arg2[%77, %c0_56, %c0_57] : memref<6x128x128xf32, #tpu.memory_space<vmem>>, vector<1x128x128xf32>
    %79 = vector.shape_cast %78 : vector<1x128x128xf32> to vector<128x128xf32>
    %80 = arith.index_cast %c3_i32 : i32 to index
    %c0_58 = arith.constant 0 : index
    %c0_59 = arith.constant 0 : index
    %81 = vector.load %arg3[%80, %c0_58, %c0_59] : memref<6x1x128xf32, #tpu.memory_space<vmem>>, vector<1x1x128xf32>
    %82 = vector.shape_cast %81 : vector<1x1x128xf32> to vector<1x128xf32>
    %c0_60 = arith.constant 0 : index
    %c0_61 = arith.constant 0 : index
    %83 = vector.load %arg5[%c0_60, %c0_61] : memref<8x128xf32, #tpu.memory_space<vmem>>, vector<8x128xf32>
    %cst_62 = arith.constant dense<0.000000e+00> : vector<8x128xf32>
    %84 = tpu.matmul %83, %79, %cst_62 {dimension_numbers = #tpu.dot_dimension_numbers<[1], [0], [0], [1], [0, 0, 1, 1], [], []>} : vector<8x128xf32>, vector<128x128xf32>, vector<8x128xf32> -> vector<8x128xf32>
    %85 = vector.broadcast %82 : vector<1x128xf32> to vector<8x128xf32>
    %86 = arith.addf %84, %85 : vector<8x128xf32>
    %c2_i32_63 = arith.constant 2 : i32
    %c0_i32_64 = arith.constant 0 : i32
    %87 = arith.cmpi eq, %c2_i32_63, %c0_i32_64 : i32
    %c1_i32_65 = arith.constant 1 : i32
    %88 = arith.select %87, %c1_i32_65, %c2_i32_63 : i32
    %89 = arith.remsi %c3_i32, %88 : i32
    %c0_i32_66 = arith.constant 0 : i32
    %90 = arith.cmpi ne, %89, %c0_i32_66 : i32
    %c0_i32_67 = arith.constant 0 : i32
    %91 = arith.cmpi slt, %89, %c0_i32_67 : i32
    %c0_i32_68 = arith.constant 0 : i32
    %92 = arith.cmpi slt, %88, %c0_i32_68 : i32
    %93 = arith.xori %91, %92 : i1
    %94 = arith.andi %93, %90 : i1
    %95 = arith.addi %89, %88 : i32
    %96 = arith.select %94, %95, %89 : i32
    %c0_i32_69 = arith.constant 0 : i32
    %97 = arith.cmpi eq, %96, %c0_i32_69 : i32
    %cst_70 = arith.constant 0.000000e+00 : f32
    %cst_71 = arith.constant 0xFF800000 : f32
    %98 = arith.select %97, %cst_70, %cst_71 : f32
    %99 = vector.broadcast %98 : f32 to vector<8x128xf32>
    %100 = arith.maximumf %86, %99 : vector<8x128xf32>
    %c0_72 = arith.constant 0 : index
    %c0_73 = arith.constant 0 : index
    %101 = vector.load %arg5[%c0_72, %c0_73] : memref<8x128xf32, #tpu.memory_space<vmem>>, vector<8x128xf32>
    tpu.vector_store %arg5[%c0_72, %c0_73], %100 {strides = array<i32>} : memref<8x128xf32, #tpu.memory_space<vmem>>, vector<8x128xf32>,
    %c4_i32 = arith.constant 4 : i32
    %102 = arith.index_cast %c4_i32 : i32 to index
    %c0_74 = arith.constant 0 : index
    %c0_75 = arith.constant 0 : index
    %103 = vector.load %arg2[%102, %c0_74, %c0_75] : memref<6x128x128xf32, #tpu.memory_space<vmem>>, vector<1x128x128xf32>
    %104 = vector.shape_cast %103 : vector<1x128x128xf32> to vector<128x128xf32>
    %105 = arith.index_cast %c4_i32 : i32 to index
    %c0_76 = arith.constant 0 : index
    %c0_77 = arith.constant 0 : index
    %106 = vector.load %arg3[%105, %c0_76, %c0_77] : memref<6x1x128xf32, #tpu.memory_space<vmem>>, vector<1x1x128xf32>
    %107 = vector.shape_cast %106 : vector<1x1x128xf32> to vector<1x128xf32>
    %c0_78 = arith.constant 0 : index
    %c0_79 = arith.constant 0 : index
    %108 = vector.load %arg5[%c0_78, %c0_79] : memref<8x128xf32, #tpu.memory_space<vmem>>, vector<8x128xf32>
    %cst_80 = arith.constant dense<0.000000e+00> : vector<8x128xf32>
    %109 = tpu.matmul %108, %104, %cst_80 {dimension_numbers = #tpu.dot_dimension_numbers<[1], [0], [0], [1], [0, 0, 1, 1], [], []>} : vector<8x128xf32>, vector<128x128xf32>, vector<8x128xf32> -> vector<8x128xf32>
    %110 = vector.broadcast %107 : vector<1x128xf32> to vector<8x128xf32>
    %111 = arith.addf %109, %110 : vector<8x128xf32>
    %c2_i32_81 = arith.constant 2 : i32
    %c0_i32_82 = arith.constant 0 : i32
    %112 = arith.cmpi eq, %c2_i32_81, %c0_i32_82 : i32
    %c1_i32_83 = arith.constant 1 : i32
    %113 = arith.select %112, %c1_i32_83, %c2_i32_81 : i32
    %114 = arith.remsi %c4_i32, %113 : i32
    %c0_i32_84 = arith.constant 0 : i32
    %115 = arith.cmpi ne, %114, %c0_i32_84 : i32
    %c0_i32_85 = arith.constant 0 : i32
    %116 = arith.cmpi slt, %114, %c0_i32_85 : i32
    %c0_i32_86 = arith.constant 0 : i32
    %117 = arith.cmpi slt, %113, %c0_i32_86 : i32
    %118 = arith.xori %116, %117 : i1
    %119 = arith.andi %118, %115 : i1
    %120 = arith.addi %114, %113 : i32
    %121 = arith.select %119, %120, %114 : i32
    %c0_i32_87 = arith.constant 0 : i32
    %122 = arith.cmpi eq, %121, %c0_i32_87 : i32
    %cst_88 = arith.constant 0.000000e+00 : f32
    %cst_89 = arith.constant 0xFF800000 : f32
    %123 = arith.select %122, %cst_88, %cst_89 : f32
    %124 = vector.broadcast %123 : f32 to vector<8x128xf32>
    %125 = arith.maximumf %111, %124 : vector<8x128xf32>
    %c0_90 = arith.constant 0 : index
    %c0_91 = arith.constant 0 : index
    %126 = vector.load %arg5[%c0_90, %c0_91] : memref<8x128xf32, #tpu.memory_space<vmem>>, vector<8x128xf32>
    tpu.vector_store %arg5[%c0_90, %c0_91], %125 {strides = array<i32>} : memref<8x128xf32, #tpu.memory_space<vmem>>, vector<8x128xf32>,
    %c5_i32 = arith.constant 5 : i32
    %127 = arith.index_cast %c5_i32 : i32 to index
    %c0_92 = arith.constant 0 : index
    %c0_93 = arith.constant 0 : index
    %128 = vector.load %arg2[%127, %c0_92, %c0_93] : memref<6x128x128xf32, #tpu.memory_space<vmem>>, vector<1x128x128xf32>
    %129 = vector.shape_cast %128 : vector<1x128x128xf32> to vector<128x128xf32>
    %130 = arith.index_cast %c5_i32 : i32 to index
    %c0_94 = arith.constant 0 : index
    %c0_95 = arith.constant 0 : index
    %131 = vector.load %arg3[%130, %c0_94, %c0_95] : memref<6x1x128xf32, #tpu.memory_space<vmem>>, vector<1x1x128xf32>
    %132 = vector.shape_cast %131 : vector<1x1x128xf32> to vector<1x128xf32>
    %c0_96 = arith.constant 0 : index
    %c0_97 = arith.constant 0 : index
    %133 = vector.load %arg5[%c0_96, %c0_97] : memref<8x128xf32, #tpu.memory_space<vmem>>, vector<8x128xf32>
    %cst_98 = arith.constant dense<0.000000e+00> : vector<8x128xf32>
    %134 = tpu.matmul %133, %129, %cst_98 {dimension_numbers = #tpu.dot_dimension_numbers<[1], [0], [0], [1], [0, 0, 1, 1], [], []>} : vector<8x128xf32>, vector<128x128xf32>, vector<8x128xf32> -> vector<8x128xf32>
    %135 = vector.broadcast %132 : vector<1x128xf32> to vector<8x128xf32>
    %136 = arith.addf %134, %135 : vector<8x128xf32>
    %c2_i32_99 = arith.constant 2 : i32
    %c0_i32_100 = arith.constant 0 : i32
    %137 = arith.cmpi eq, %c2_i32_99, %c0_i32_100 : i32
    %c1_i32_101 = arith.constant 1 : i32
    %138 = arith.select %137, %c1_i32_101, %c2_i32_99 : i32
    %139 = arith.remsi %c5_i32, %138 : i32
    %c0_i32_102 = arith.constant 0 : i32
    %140 = arith.cmpi ne, %139, %c0_i32_102 : i32
    %c0_i32_103 = arith.constant 0 : i32
    %141 = arith.cmpi slt, %139, %c0_i32_103 : i32
    %c0_i32_104 = arith.constant 0 : i32
    %142 = arith.cmpi slt, %138, %c0_i32_104 : i32
    %143 = arith.xori %141, %142 : i1
    %144 = arith.andi %143, %140 : i1
    %145 = arith.addi %139, %138 : i32
    %146 = arith.select %144, %145, %139 : i32
    %c0_i32_105 = arith.constant 0 : i32
    %147 = arith.cmpi eq, %146, %c0_i32_105 : i32
    %cst_106 = arith.constant 0.000000e+00 : f32
    %cst_107 = arith.constant 0xFF800000 : f32
    %148 = arith.select %147, %cst_106, %cst_107 : f32
    %149 = vector.broadcast %148 : f32 to vector<8x128xf32>
    %150 = arith.maximumf %136, %149 : vector<8x128xf32>
    %c0_108 = arith.constant 0 : index
    %c0_109 = arith.constant 0 : index
    %151 = vector.load %arg5[%c0_108, %c0_109] : memref<8x128xf32, #tpu.memory_space<vmem>>, vector<8x128xf32>
    tpu.vector_store %arg5[%c0_108, %c0_109], %150 {strides = array<i32>} : memref<8x128xf32, #tpu.memory_space<vmem>>, vector<8x128xf32>,
    %c6_i32 = arith.constant 6 : i32
    %c0_110 = arith.constant 0 : index
    %c0_111 = arith.constant 0 : index
    %152 = vector.load %arg5[%c0_110, %c0_111] : memref<8x128xf32, #tpu.memory_space<vmem>>, vector<8x128xf32>
    %c0_112 = arith.constant 0 : index
    %c0_113 = arith.constant 0 : index
    %153 = vector.load %arg4[%c0_112, %c0_113] : memref<8x128xf32, #tpu.memory_space<vmem>>, vector<8x128xf32>
    tpu.vector_store %arg4[%c0_112, %c0_113], %152 {strides = array<i32>} : memref<8x128xf32, #tpu.memory_space<vmem>>, vector<8x128xf32>,
    return
  }
  func.func @transform_0(%arg0: i32) -> (i32, i32) {
    %c0_i32 = arith.constant 0 : i32
    %c0_i32_0 = arith.constant 0 : i32
    return %arg0, %c0_i32 : i32, i32
  }
  func.func @transform_1(%arg0: i32) -> (i32, i32, i32) {
    %c0_i32 = arith.constant 0 : i32
    %c0_i32_0 = arith.constant 0 : i32
    %c0_i32_1 = arith.constant 0 : i32
    %c0_i32_2 = arith.constant 0 : i32
    return %c0_i32, %c0_i32_0, %c0_i32_1 : i32, i32, i32
  }
  func.func @transform_2(%arg0: i32) -> (i32, i32, i32) {
    %c0_i32 = arith.constant 0 : i32
    %c0_i32_0 = arith.constant 0 : i32
    %c0_i32_1 = arith.constant 0 : i32
    %c0_i32_2 = arith.constant 0 : i32
    return %c0_i32, %c0_i32_0, %c0_i32_1 : i32, i32, i32
  }
  func.func @transform_3(%arg0: i32) -> (i32, i32) {
    %c0_i32 = arith.constant 0 : i32
    %c0_i32_0 = arith.constant 0 : i32
    return %arg0, %c0_i32 : i32, i32
  }
}

</mosaic_0001>

<bundles_post_ra>
// kernel: critic_forward.1
= control target key start
LH: loop header
LB: loop body
LE: loop exit
PB: predicated region body
PF: predicated region fallthrough
CT: control target
= control target key end

     0   :  { %8 = vsyncpa [#allocation4], 0  ;;  %s344_s15 = smov [#allocation3]   ;;  %s345_s17 = smov 128   ;;  %s394_s0 = inlined_call_operand.vmem [shape: f32[8,128], index: 0, kind: input, shape index: {}]   ;;  %s395_s1 = inlined_call_operand.hbm [shape: f32[6,128,128], index: 1, kind: input, shape index: {}]   ;;  %s396_s2 = inlined_call_operand.vmem [shape: f32[6,1,128], index: 2, kind: input, shape index: {}]   ;;  %s397_s3 = inlined_call_operand.vmem [shape: f32[8,128], index: 3, kind: output, shape index: {}]  }
   0x1   :  { %s15_s14 = sshll.u32 %s395_s1, 4  ;;  %s17_s16 = sshll.u32 %s344_s15, 4  ;;  %s16_s14 = int_to_ptr.hbm [resolvable:$true] %s15_s14  ;;  %s18_s16 = int_to_ptr.vmem [resolvable:$true] %s17_s16 }
   0x2   :  { %s346_s18 = smov 8  }
   0x3   :  { %23 = dma.hbm_to_vmem [thread:$0]  %s16_s14, 12288, %s18_s16, [#allocation4], %s345_s17, %s345_s17, %s346_s18  }
   0x4   :  { %342 = dma.done.wait [#allocation4], 12288  }
   0x5   :  { %343 = vsyncadd [#allocation4], 4294955008  ;;  %v47_v0 = vld [vmem:[#allocation3 + $0x78] sm:$0xff]  ;;  %v46_v1 = vld [vmem:[#allocation3 + $0x70] sm:$0xff] }
   0x6   :  { %53 = vmatpush.msra.mxu0 %v47_v0  ;;  %v45_v2 = vld [vmem:[#allocation3 + $0x68] sm:$0xff]  ;;  %v44_v3 = vld [vmem:[#allocation3 + $0x60] sm:$0xff]  ;;  %v91_v4 = vld [vmem:[#allocation3 + $0xf8] sm:$0xff] }
   0x7   :  { %v43_v5 = vld [vmem:[#allocation3 + $0x58] sm:$0xff]  ;;  %98 = vmatpush.msra.mxu1 %v91_v4  ;;  %v90_v6 = vld [vmem:[#allocation3 + $0xf0] sm:$0xff]  ;;  %v89_v7 = vld [vmem:[#allocation3 + $0xe8] sm:$0xff] }
   0x8   :  { %54 = vmatpush.msra.mxu0 %v46_v1  ;;  %v42_v8 = vld [vmem:[#allocation3 + $0x50] sm:$0xff]  ;;  %v41_v9 = vld [vmem:[#allocation3 + $0x48] sm:$0xff]  ;;  %v88_v10 = vld [vmem:[#allocation3 + $0xe0] sm:$0xff] }
   0x9   :  { %99 = vmatpush.msra.mxu1 %v90_v6  ;;  %v87_v11 = vld [vmem:[#allocation3 + $0xd8] sm:$0xff]  ;;  %v40_v12 = vld [vmem:[#allocation3 + $0x40] sm:$0xff]  ;;  %v86_v13 = vld [vmem:[#allocation3 + $0xd0] sm:$0xff] }
   0xa   :  { %55 = vmatpush.msra.mxu0 %v45_v2  ;;  %v39_v14 = vld [vmem:[#allocation3 + $0x38] sm:$0xff]  ;;  %v85_v15 = vld [vmem:[#allocation3 + $0xc8] sm:$0xff]  ;;  %v38_v16 = vld [vmem:[#allocation3 + $0x30] sm:$0xff] }
   0xb   :  { %100 = vmatpush.msra.mxu1 %v89_v7  ;;  %v84_v17 = vld [vmem:[#allocation3 + $0xc0] sm:$0xff]  ;;  %v37_v18 = vld [vmem:[#allocation3 + $0x28] sm:$0xff]  ;;  %v83_v19 = vld [vmem:[#allocation3 + $0xb8] sm:$0xff] }
   0xc   :  { %56 = vmatpush.msra.mxu0 %v44_v3  ;;  %v36_v20 = vld [vmem:[#allocation3 + $0x20] sm:$0xff]  ;;  %v82_v21 = vld [vmem:[#allocation3 + $0xb0] sm:$0xff]  ;;  %v35_v22 = vld [vmem:[#allocation3 + $0x18] sm:$0xff] }
   0xd   :  { %101 = vmatpush.msra.mxu1 %v88_v10  ;;  %v81_v23 = vld [vmem:[#allocation3 + $0xa8] sm:$0xff]  ;;  %v34_v24 = vld [vmem:[#allocation3 + $0x10] sm:$0xff]  ;;  %v80_v25 = vld [vmem:[#allocation3 + $0xa0] sm:$0xff] }
   0xe   :  { %57 = vmatpush.msra.mxu0 %v43_v5  ;;  %v33_v26 = vld [vmem:[#allocation3 + $0x8] sm:$0xff]  ;;  %v79_v27 = vld [vmem:[#allocation3 + $0x98] sm:$0xff]  ;;  %v32_v28 = vld [vmem:[#allocation3] sm:$0xff] }
   0xf   :  { %102 = vmatpush.msra.mxu1 %v87_v11  ;;  %v30_v29 = vld [vmem:[%s394_s0] sm:$0xff]  ;;  %v78_v30 = vld [vmem:[#allocation3 + $0x90] sm:$0xff]  ;;  %v77_v31 = vld [vmem:[#allocation3 + $0x88] sm:$0xff] }
  0x10   :  { %58 = vmatpush.msra.mxu0 %v42_v8  ;;  %v76_v32 = vld [vmem:[#allocation3 + $0x80] sm:$0xff]  ;;  %v135_v33 = vld [vmem:[#allocation3 + $0x178] sm:$0xff]  ;;  %v134_v34 = vld [vmem:[#allocation3 + $0x170] sm:$0xff] }
  0x11   :  { %103 = vmatpush.msra.mxu1 %v86_v13  ;;  %142 = vmatpush.msra.mxu2 %v135_v33  ;;  %v133_v35 = vld [vmem:[#allocation3 + $0x168] sm:$0xff]  ;;  %v132_v36 = vld [vmem:[#allocation3 + $0x160] sm:$0xff]  ;;  %v131_v37 = vld [vmem:[#allocation3 + $0x158] sm:$0xff] }
  0x12   :  { %59 = vmatpush.msra.mxu0 %v41_v9  ;;  %v130_v38 = vld [vmem:[#allocation3 + $0x150] sm:$0xff]  ;;  %v129_v39 = vld [vmem:[#allocation3 + $0x148] sm:$0xff]  ;;  %v128_v40 = vld [vmem:[#allocation3 + $0x140] sm:$0xff] }
  0x13   :  { %104 = vmatpush.msra.mxu1 %v85_v15  ;;  %143 = vmatpush.msra.mxu2 %v134_v34  ;;  %v127_v41 = vld [vmem:[#allocation3 + $0x138] sm:$0xff]  ;;  %v126_v42 = vld [vmem:[#allocation3 + $0x130] sm:$0xff]  ;;  %v125_v43 = vld [vmem:[#allocation3 + $0x128] sm:$0xff] }
  0x14   :  { %60 = vmatpush.msra.mxu0 %v40_v12  ;;  %v124_v44 = vld [vmem:[#allocation3 + $0x120] sm:$0xff]  ;;  %v123_v45 = vld [vmem:[#allocation3 + $0x118] sm:$0xff]  ;;  %v122_v47 = vld [vmem:[#allocation3 + $0x110] sm:$0xff] }
  0x15   :  { %105 = vmatpush.msra.mxu1 %v84_v17  ;;  %144 = vmatpush.msra.mxu2 %v133_v35  ;;  %v312_v46 = vld [vmem:[%s396_s2] ss:$0 sm:$0xff]  ;;  %v121_v51 = vld [vmem:[#allocation3 + $0x108] sm:$0xff]  ;;  %v180_v53 = vld [vmem:[#allocation3 + $0x1f8] sm:$0xff] }
  0x16   :  { %61 = vmatpush.msra.mxu0 %v39_v14  ;;  %v120_v52 = vld [vmem:[#allocation3 + $0x100] sm:$0xff]  ;;  %v179_v54 = vld [vmem:[#allocation3 + $0x1f0] sm:$0xff]  ;;  %187 = vmatpush.msra.mxu3 %v180_v53  ;;  %v178_v55 = vld [vmem:[#allocation3 + $0x1e8] sm:$0xff] }
  0x17   :  { %106 = vmatpush.msra.mxu1 %v83_v19  ;;  %145 = vmatpush.msra.mxu2 %v132_v36  ;;  %v177_v56 = vld [vmem:[#allocation3 + $0x1e0] sm:$0xff]  ;;  %v176_v57 = vld [vmem:[#allocation3 + $0x1d8] sm:$0xff]  ;;  %v175_v58 = vld [vmem:[#allocation3 + $0x1d0] sm:$0xff] }
  0x18   :  { %62 = vmatpush.msra.mxu0 %v38_v16  ;;  %188 = vmatpush.msra.mxu3 %v179_v54  ;;  %v174_v59 = vld [vmem:[#allocation3 + $0x1c8] sm:$0xff]  ;;  %v173_v60 = vld [vmem:[#allocation3 + $0x1c0] sm:$0xff]  ;;  %v172_v61 = vld [vmem:[#allocation3 + $0x1b8] sm:$0xff] }
  0x19   :  { %107 = vmatpush.msra.mxu1 %v82_v21  ;;  %146 = vmatpush.msra.mxu2 %v131_v37  ;;  %v171_v62 = vld [vmem:[#allocation3 + $0x1b0] sm:$0xff]  ;;  %v170_v63 = vld [vmem:[#allocation3 + $0x1a8] sm:$0xff]  ;;  %v169_v0 = vld [vmem:[#allocation3 + $0x1a0] sm:$0xff] }
  0x1a   :  { %63 = vmatpush.msra.mxu0 %v37_v18  ;;  %189 = vmatpush.msra.mxu3 %v178_v55  ;;  %v168_v1 = vld [vmem:[#allocation3 + $0x198] sm:$0xff]  ;;  %v313_v2 = vld [vmem:[%s396_s2 + $0x1] ss:$0 sm:$0xff]  ;;  %v167_v5 = vld [vmem:[#allocation3 + $0x190] sm:$0xff] }
  0x1b   :  { %108 = vmatpush.msra.mxu1 %v81_v23  ;;  %147 = vmatpush.msra.mxu2 %v130_v38  ;;  %v166_v6 = vld [vmem:[#allocation3 + $0x188] sm:$0xff]  ;;  %v165_v7 = vld [vmem:[#allocation3 + $0x180] sm:$0xff]  ;;  %v224_v8 = vld [vmem:[#allocation3 + $0x278] sm:$0xff] }
  0x1c   :  { %64 = vmatpush.msra.mxu0 %v36_v20  ;;  %190 = vmatpush.msra.mxu3 %v177_v56  ;;  %v223_v9 = vld [vmem:[#allocation3 + $0x270] sm:$0xff]  ;;  %v222_v10 = vld [vmem:[#allocation3 + $0x268] sm:$0xff]  ;;  %v221_v11 = vld [vmem:[#allocation3 + $0x260] sm:$0xff] }
  0x1d   :  { %109 = vmatpush.msra.mxu1 %v80_v25  ;;  %148 = vmatpush.msra.mxu2 %v129_v39  ;;  %v220_v12 = vld [vmem:[#allocation3 + $0x258] sm:$0xff]  ;;  %v219_v13 = vld [vmem:[#allocation3 + $0x250] sm:$0xff]  ;;  %v218_v14 = vld [vmem:[#allocation3 + $0x248] sm:$0xff] }
  0x1e   :  { %65 = vmatpush.msra.mxu0 %v35_v22  ;;  %191 = vmatpush.msra.mxu3 %v176_v57  ;;  %v217_v15 = vld [vmem:[#allocation3 + $0x240] sm:$0xff]  ;;  %v216_v16 = vld [vmem:[#allocation3 + $0x238] sm:$0xff]  ;;  %v215_v17 = vld [vmem:[#allocation3 + $0x230] sm:$0xff] }
  0x1f   :  { %110 = vmatpush.msra.mxu1 %v79_v27  ;;  %149 = vmatpush.msra.mxu2 %v128_v40  ;;  %v214_v18 = vld [vmem:[#allocation3 + $0x228] sm:$0xff]  ;;  %v213_v19 = vld [vmem:[#allocation3 + $0x220] sm:$0xff]  ;;  %v212_v20 = vld [vmem:[#allocation3 + $0x218] sm:$0xff] }
  0x20   :  { %66 = vmatpush.msra.mxu0 %v34_v24  ;;  %192 = vmatpush.msra.mxu3 %v175_v58  ;;  %v314_v21 = vld [vmem:[%s396_s2 + $0x2] ss:$0 sm:$0xff]  ;;  %v211_v22 = vld [vmem:[#allocation3 + $0x210] sm:$0xff]  ;;  %v263_v34 = vld [vmem:[#allocation3 + $0x2c8] sm:$0xff] }
  0x21   :  { %111 = vmatpush.msra.mxu1 %v78_v30  ;;  %150 = vmatpush.msra.mxu2 %v127_v41  ;;  %v209_v27 = vld [vmem:[#allocation3 + $0x200] sm:$0xff]  ;;  %v267_v30 = vld [vmem:[#allocation3 + $0x2e8] sm:$0xff]  ;;  %v264_v33 = vld [vmem:[#allocation3 + $0x2d0] sm:$0xff] }
  0x22   :  { %67 = vmatpush.msra.mxu0 %v33_v26  ;;  %193 = vmatpush.msra.mxu3 %v174_v59  ;;  %v210_v26 = vld [vmem:[#allocation3 + $0x208] sm:$0xff]  ;;  %v262_v35 = vld [vmem:[#allocation3 + $0x2c0] sm:$0xff]  ;;  %v261_v36 = vld [vmem:[#allocation3 + $0x2b8] sm:$0xff] }
  0x23   :  { %112 = vmatpush.msra.mxu1 %v77_v31  ;;  %151 = vmatpush.msra.mxu2 %v126_v42  ;;  %v266_v31 = vld [vmem:[#allocation3 + $0x2e0] sm:$0xff]  ;;  %v260_v37 = vld [vmem:[#allocation3 + $0x2b0] sm:$0xff]  ;;  %v259_v38 = vld [vmem:[#allocation3 + $0x2a8] sm:$0xff] }
  0x24   :  { %68 = vmatpush.msra.mxu0 %v32_v28  ;;  %194 = vmatpush.msra.mxu3 %v173_v60  ;;  %v269_v28 = vld [vmem:[#allocation3 + $0x2f8] sm:$0xff]  ;;  %v258_v39 = vld [vmem:[#allocation3 + $0x2a0] sm:$0xff] }
  0x25   :  { %69 = vmatmul.f32.vlgmr.msra.gmra.mxu0 %v30_v29  ;;  %113 = vmatpush.msra.mxu1 %v76_v32  ;;  %v268_v29 = vld [vmem:[#allocation3 + $0x2f0] sm:$0xff]  ;;  %v265_v32 = vld [vmem:[#allocation3 + $0x2d8] sm:$0xff]  ;;  %v315_v41 = vld [vmem:[%s396_s2 + $0x3] ss:$0 sm:$0xff] }
  0x26   :  { %152 = vmatpush.msra.mxu2 %v125_v43  ;;  %195 = vmatpush.msra.mxu3 %v172_v61  ;;  %v257_v40 = vld [vmem:[#allocation3 + $0x298] sm:$0xff] }
  0x27   :  { %231 = vmatpush.msrb.mxu0 %v224_v8  ;;  %276 = vmatpush.msrb.mxu1 %v269_v28 }
  0x28   :  { %153 = vmatpush.msra.mxu2 %v124_v44  ;;  %196 = vmatpush.msra.mxu3 %v171_v62  ;;  %v256_v44 = vld [vmem:[#allocation3 + $0x290] sm:$0xff] }
  0x29   :  { %232 = vmatpush.msrb.mxu0 %v223_v9  ;;  %277 = vmatpush.msrb.mxu1 %v268_v29 }
  0x2a   :  { %154 = vmatpush.msra.mxu2 %v123_v45  ;;  %197 = vmatpush.msra.mxu3 %v170_v63  ;;  %v255_v45 = vld [vmem:[#allocation3 + $0x288] sm:$0xff] }
  0x2b   :  { %233 = vmatpush.msrb.mxu0 %v222_v10  ;;  %278 = vmatpush.msrb.mxu1 %v267_v30 }
  0x2c   :  { %155 = vmatpush.msra.mxu2 %v122_v47  ;;  %198 = vmatpush.msra.mxu3 %v169_v0  ;;  %v316_v47 = vld [vmem:[%s396_s2 + $0x4] ss:$0 sm:$0xff] }
  0x2d   :  { %234 = vmatpush.msrb.mxu0 %v221_v11  ;;  %279 = vmatpush.msrb.mxu1 %v266_v31 }
  0x2e   :  { %156 = vmatpush.msra.mxu2 %v121_v51  ;;  %199 = vmatpush.msra.mxu3 %v168_v1  ;;  %v317_v51 = vld [vmem:[%s396_s2 + $0x5] ss:$0 sm:$0xff] }
  0x2f   :  { %235 = vmatpush.msrb.mxu0 %v220_v12  ;;  %280 = vmatpush.msrb.mxu1 %v265_v32 }
  0x30   :  { %157 = vmatpush.msra.mxu2 %v120_v52  ;;  %200 = vmatpush.msra.mxu3 %v167_v5 }
  0x31   :  { %236 = vmatpush.msrb.mxu0 %v219_v13  ;;  %281 = vmatpush.msrb.mxu1 %v264_v33 }
  0x32   :  { %201 = vmatpush.msra.mxu3 %v166_v6 }
  0x33   :  { %237 = vmatpush.msrb.mxu0 %v218_v14  ;;  %282 = vmatpush.msrb.mxu1 %v263_v34 }
  0x34   :  { %202 = vmatpush.msra.mxu3 %v165_v7 }
  0x35   :  { %238 = vmatpush.msrb.mxu0 %v217_v15  ;;  %283 = vmatpush.msrb.mxu1 %v262_v35 }
  0x37   :  { %239 = vmatpush.msrb.mxu0 %v216_v16  ;;  %284 = vmatpush.msrb.mxu1 %v261_v36 }
  0x39   :  { %240 = vmatpush.msrb.mxu0 %v215_v17  ;;  %285 = vmatpush.msrb.mxu1 %v260_v37 }
  0x3b   :  { %241 = vmatpush.msrb.mxu0 %v214_v18  ;;  %286 = vmatpush.msrb.mxu1 %v259_v38 }
  0x3d   :  { %242 = vmatpush.msrb.mxu0 %v213_v19  ;;  %287 = vmatpush.msrb.mxu1 %v258_v39 }
  0x3f   :  { %243 = vmatpush.msrb.mxu0 %v212_v20  ;;  %288 = vmatpush.msrb.mxu1 %v257_v40 }
  0x41   :  { %244 = vmatpush.msrb.mxu0 %v211_v22  ;;  %289 = vmatpush.msrb.mxu1 %v256_v44 }
  0x43   :  { %245 = vmatpush.msrb.mxu0 %v210_v26  ;;  %290 = vmatpush.msrb.mxu1 %v255_v45 }
  0x45   :  { %246 = vmatpush.msrb.mxu0 %v209_v27 }
  0xa2   :  { %v70_v48 = vpop.f32.mrf.mxu0 }
  0xa3   :  { %v71_v49 = vadd.f32 %v312_v46, %v70_v48  ;;  %v254_v46 = vld [vmem:[#allocation3 + $0x280] sm:$0xff] }
  0xa4   :  { %291 = vmatpush.msrb.mxu1 %v254_v46 }
  0xa5   :  { %v73_v50 = vmax.f32 %v71_v49, 0.0 }
  0xa7   :  { %114 = vmatmul.f32.vlgmr.msra.gmra.mxu1 %v73_v50 }
 0x124   :  { %v115_v3 = vpop.f32.mrf.mxu1 }
 0x125   :  { %v116_v4 = vadd.f32 %v313_v2, %v115_v3 }
 0x127   :  { %158 = vmatmul.f32.vlgmr.msra.gmra.mxu2 %v116_v4 }
 0x1aa   :  { %v159_v23 = vpop.f32.mrf.mxu2 }
 0x1ab   :  { %v160_v24 = vadd.f32 %v314_v21, %v159_v23 }
 0x1ad   :  { %v162_v25 = vmax.f32 %v160_v24, 0.0 }
 0x1af   :  { %203 = vmatmul.f32.vlgmr.msra.gmra.mxu3 %v162_v25 }
 0x232   :  { %v204_v42 = vpop.f32.mrf.mxu3 }
 0x233   :  { %v205_v43 = vadd.f32 %v315_v41, %v204_v42 }
 0x235   :  { %247 = vmatmul.f32.vlgmr.msrb.gmra.mxu0 %v205_v43 }
 0x2b2   :  { %v248_v48 = vpop.f32.mrf.mxu0 }
 0x2b3   :  { %v249_v49 = vadd.f32 %v316_v47, %v248_v48 }
 0x2b5   :  { %v251_v50 = vmax.f32 %v249_v49, 0.0 }
 0x2b7   :  { %292 = vmatmul.f32.vlgmr.msrb.gmra.mxu1 %v251_v50 }
 0x334   :  { %v293_v52 = vpop.f32.mrf.mxu1 }
 0x335   :  { %v294_v53 = vadd.f32 %v317_v51, %v293_v52 }
 0x337   :  { %298 = vst [vmem:[%s397_s3] sm:$0xff] %v294_v53 }
 0x338   :  { %303 = vsyncpa [#allocation4], 1 }

</bundles_post_ra>
